<compile_context>
chip_gen: v6e
topology: v6e:2x2x1
jax: 0.10.0
libtpu: 0.0.40
codegen_flags: <defaults>
</compile_context>

<pallas_src>
import functools

import jax
import jax.numpy as jnp
from jax.experimental import pallas as pl
from jax.experimental.pallas import tpu as pltpu

LN_EPS = 1e-5   # PyTorch nn.LayerNorm default
LANE = 128


def _round_up(x, m):
    return (x + m - 1) // m * m


@functools.lru_cache(maxsize=1)
def _vmem_capacity_bytes():
    """Per-TensorCore VMEM capacity; conservative fallback = v7x's 64 MiB."""
    try:
        return int(pltpu.get_tpu_info().vmem_capacity_bytes)
    except Exception:  # pragma: no cover - defensive fallback
        return 64 << 20


def _layer_norm(h, gamma, beta, inv_valid, valid):
    """LayerNorm over the last axis, two-pass (centered) variance in f32.

    `h` may be lane-padded; padded lanes of `h` are exactly zero and gamma/beta
    are zero-padded, so only the variance needs masking (compile-time lane mask
    when valid != hid_p). `inv_valid` = 1/hidden (true, unpadded size).
    """
    hid_p = h.shape[-1]
    mu = jnp.sum(h, axis=-1, keepdims=True) * inv_valid
    centered = h - mu
    if valid != hid_p:
        lane = jax.lax.broadcasted_iota(jnp.int32, (1, hid_p), 1)
        centered = jnp.where(lane < valid, centered, 0.0)
    var = jnp.sum(centered * centered, axis=-1, keepdims=True) * inv_valid
    return centered * jax.lax.rsqrt(var + LN_EPS) * gamma + beta


def modality_encoder_kernel(x_ref, w1_ref, w2_ref, vec_ref, o_ref,
                            *, inv_hidden, hidden, matmul_dtype):
    x = x_ref[...].astype(matmul_dtype)          # per-tile cast (VPU, pipelined)

    vecs = vec_ref[...]                           # (8, hid_p) f32, packed params
    b1, g1, be1 = vecs[0:1], vecs[1:2], vecs[2:3]
    b2, g2, be2 = vecs[3:4], vecs[4:5], vecs[5:6]

    # Linear 1: bf16 (or f32) MXU operands, f32 accumulation, + bias.
    h = jnp.dot(x, w1_ref[...], preferred_element_type=jnp.float32) + b1
    h = _layer_norm(h, g1, be1, inv_hidden, hidden)   # LayerNorm 1
    h = jnp.maximum(h, 0.0)                           # ReLU
    # Dropout: identity in eval/inference mode.
    # Linear 2 + bias.
    h = jnp.dot(h.astype(matmul_dtype), w2_ref[...],
                preferred_element_type=jnp.float32) + b2
    h = _layer_norm(h, g2, be2, inv_hidden, hidden)   # LayerNorm 2

    o_ref[...] = h.astype(o_ref.dtype)


def _resident_spec(shape):
    """Spec for a block that is identical on every grid step.

    Single buffering (the block never changes), halving its VMEM footprint —
    matters most on v7x's 64 MiB per-core VMEM.
    """
    return pl.BlockSpec(shape, lambda i: (0, 0), pipeline_mode=pl.Buffered(1))


@functools.partial(jax.jit, static_argnames=("block_rows", "matmul_dtype"))
def modality_encoder(x, params, *, block_rows=None, matmul_dtype=jnp.bfloat16):
    """x: [N, input_dim] f32/bf16. params: dict of weights (see init_params)."""
    n, d_in = x.shape
    hidden = params["w1"].shape[1]

    # Lane-dense feature dims.
    d_in_p = _round_up(d_in, LANE)
    hid_p = _round_up(hidden, LANE)

    x_item = jnp.dtype(x.dtype).itemsize
    w_item = jnp.dtype(matmul_dtype).itemsize
    # Sub-32-bit dtypes pack along sublanes: bf16 wants 16-row, 8-bit 32-row tiles.
    row_align = {1: 32, 2: 16}.get(x_item, 8)

    # --- Generation-aware row-tile sizing (per-TensorCore VMEM) -------------
    vmem_cap = _vmem_capacity_bytes()
    # Resident, single-buffered: w1, w2 (matmul dtype) + packed LN/bias vectors (f32).
    resident = (d_in_p * hid_p + hid_p * hid_p) * w_item + 8 * hid_p * 4
    per_row = (2 * d_in_p * x_item          # x row tile, double buffered
               + 2 * hid_p * x_item         # out row tile, double buffered
               + 2 * hid_p * 4              # f32 intermediates in the body
               + (d_in_p + hid_p) * w_item)  # casts feeding the MXU
    budget = int(vmem_cap * 0.8) - resident - (2 << 20)
    if block_rows is None:
        br = max(row_align, min(1024, budget // max(per_row, 1)))
    else:
        br = max(row_align, block_rows)
    br = min(br, _round_up(n, row_align))
    br = max(row_align, (br // row_align) * row_align)
    n_p = _round_up(n, br)

    # --- Operand prep: pads only when actually needed (fast path otherwise) --
    xp = x
    if n_p != n or d_in_p != d_in:
        xp = jnp.pad(x, ((0, n_p - n), (0, d_in_p - d_in)))

    w1 = params["w1"].astype(matmul_dtype)
    w2 = params["w2"].astype(matmul_dtype)
    if d_in_p != d_in or hid_p != hidden:
        w1 = jnp.pad(w1, ((0, d_in_p - d_in), (0, hid_p - hidden)))
    if hid_p != hidden:
        w2 = jnp.pad(w2, ((0, hid_p - hidden), (0, hid_p - hidden)))

    # Pack the six (1, hidden) vectors into one resident (8, hid_p) block.
    vecs = jnp.concatenate(
        [params["b1"], params["g1"], params["be1"],
         params["b2"], params["g2"], params["be2"],
         jnp.zeros((2, hidden), jnp.float32)], axis=0).astype(jnp.float32)
    if hid_p != hidden:
        vecs = jnp.pad(vecs, ((0, 0), (0, hid_p - hidden)))

    # --- VMEM limit: actual need, capped at this chip's per-core capacity ---
    io_bytes = 2 * br * (d_in_p + hid_p) * x_item
    body_bytes = br * (2 * hid_p * 4 + (d_in_p + hid_p) * w_item)
    vmem_limit = int(min(max(io_bytes + resident + body_bytes + (4 << 20),
                             32 << 20), vmem_cap))

    cost = pl.CostEstimate(
        flops=2 * n_p * (d_in_p + hid_p) * hid_p,
        transcendentals=2 * n_p,   # one rsqrt per row per LayerNorm
        bytes_accessed=(x_item * n_p * (d_in_p + hid_p)
                        + w_item * (d_in_p * hid_p + hid_p * hid_p)
                        + 4 * 8 * hid_p),
    )

    grid_spec = pltpu.PrefetchScalarGridSpec(
        num_scalar_prefetch=0,
        grid=(n_p // br,),
        in_specs=[
            pl.BlockSpec((br, d_in_p), lambda i: (i, 0)),   # x row tile (streamed)
            _resident_spec((d_in_p, hid_p)),                # w1 (resident, 1 buf)
            _resident_spec((hid_p, hid_p)),                 # w2 (resident, 1 buf)
            _resident_spec((8, hid_p)),                     # packed b/gamma/beta
        ],
        out_specs=pl.BlockSpec((br, hid_p), lambda i: (i, 0)),
    )

    out = pl.pallas_call(
        functools.partial(modality_encoder_kernel,
                          inv_hidden=1.0 / hidden, hidden=hidden,
                          matmul_dtype=matmul_dtype),
        out_shape=jax.ShapeDtypeStruct((n_p, hid_p), x.dtype),
        grid_spec=grid_spec,
        compiler_params=pltpu.CompilerParams(
            # Row tiles are independent -> shard across TensorCores on v7x.
            # NOTE: the VMEM budget above is per-core; each core keeps its own
            # copy of the resident weights.
            dimension_semantics=("parallel",),
            vmem_limit_bytes=vmem_limit,
        ),
        cost_estimate=cost,
    )(xp, w1, w2, vecs)

    if n_p != n or hid_p != hidden:
        out = out[:n, :hidden]
    return out


def init_params(key, input_dim, hidden_size):
    """Deterministic synthetic params (PyTorch-style uniform init for linears)."""
    k1, k2, k3, k4 = jax.random.split(key, 4)
    bound1 = 1.0 / jnp.sqrt(input_dim)
    bound2 = 1.0 / jnp.sqrt(hidden_size)
    return {
        "w1": jax.random.uniform(k1, (input_dim, hidden_size), jnp.float32,
                                 -bound1, bound1),
        "b1": jax.random.uniform(k2, (1, hidden_size), jnp.float32,
                                 -bound1, bound1),
        "g1": jnp.ones((1, hidden_size), jnp.float32),
        "be1": jnp.zeros((1, hidden_size), jnp.float32),
        "w2": jax.random.uniform(k3, (hidden_size, hidden_size), jnp.float32,
                                 -bound2, bound2),
        "b2": jax.random.uniform(k4, (1, hidden_size), jnp.float32,
                                 -bound2, bound2),
        "g2": jnp.ones((1, hidden_size), jnp.float32),
        "be2": jnp.zeros((1, hidden_size), jnp.float32),
    }


def _reference(x, p):
    h = x @ p["w1"] + p["b1"]
    mu = h.mean(-1, keepdims=True)
    var = ((h - mu) ** 2).mean(-1, keepdims=True)
    h = (h - mu) / jnp.sqrt(var + LN_EPS) * p["g1"] + p["be1"]
    h = jnp.maximum(h, 0.0)
    h = h @ p["w2"] + p["b2"]
    mu = h.mean(-1, keepdims=True)
    var = ((h - mu) ** 2).mean(-1, keepdims=True)
    return (h - mu) / jnp.sqrt(var + LN_EPS) * p["g2"] + p["be2"]


if __name__ == "__main__":
    key = jax.random.PRNGKey(0)
    kx, kp, kx2, kp2 = jax.random.split(key, 4)

    # Small shapes deliberately exercising row padding (10 not a tile multiple)
    # and lane padding (input_dim/hidden < 128 -> masked-variance LN path).
    batch, input_dim, hidden = 10, 16, 32
    x = jax.random.normal(kx, (batch, input_dim), jnp.float32)
    params = init_params(kp, input_dim, hidden)
    ref = _reference(x, params)

    out_bf16 = jax.block_until_ready(modality_encoder(x, params))  # bf16-MXU path
    out_f32 = jax.block_until_ready(
        modality_encoder(x, params, matmul_dtype=jnp.float32))     # f32-MXU path

    assert out_bf16.shape == (batch, hidden)
    assert jnp.allclose(out_f32, ref, atol=1e-4, rtol=1e-4), "f32 path mismatch"
    assert jnp.allclose(out_bf16, ref, atol=5e-2, rtol=5e-2), "bf16 path mismatch"

    # Aligned shapes exercising the no-pad / no-slice fast path with
    # lane-dense, unmasked tiles.
    x2 = jax.random.normal(kx2, (128, 128), jnp.float32)
    params2 = init_params(kp2, 128, 256)
    out2 = jax.block_until_ready(modality_encoder(x2, params2))
    assert out2.shape == (128, 256)
    assert jnp.allclose(out2, _reference(x2, params2), atol=5e-2, rtol=5e-2)

    print("KERNEL_OK")
</pallas_src>

<mosaic_0001>
module attributes {stable_mosaic.version = 11 : i64} {
  func.func @modality_encoder_kernel(%arg0: i32, %arg1: memref<16x128xf32, #tpu.memory_space<vmem>>, %arg2: memref<128x128xbf16, #tpu.memory_space<vmem>>, %arg3: memref<128x128xbf16, #tpu.memory_space<vmem>>, %arg4: memref<8x128xf32, #tpu.memory_space<vmem>>, %arg5: memref<16x128xf32, #tpu.memory_space<vmem>>) attributes {dimension_semantics = [#tpu.dimension_semantics<parallel>], iteration_bounds = array<i64: 1>, scalar_prefetch = 0 : i64, scratch_operands = 0 : i64, tpu.core_type = #tpu.core_type<tc>, window_params = [{transform_indices = @transform_0, window_bounds = array<i64: 16, 128>}, {pipeline_mode = #tpu.pipeline_mode<synchronous>, transform_indices = @transform_1, window_bounds = array<i64: 128, 128>}, {pipeline_mode = #tpu.pipeline_mode<synchronous>, transform_indices = @transform_2, window_bounds = array<i64: 128, 128>}, {pipeline_mode = #tpu.pipeline_mode<synchronous>, transform_indices = @transform_3, window_bounds = array<i64: 8, 128>}, {transform_indices = @transform_4, window_bounds = array<i64: 16, 128>}]} {
    %c0 = arith.constant 0 : index
    %c0_0 = arith.constant 0 : index
    %0 = vector.load %arg1[%c0, %c0_0] : memref<16x128xf32, #tpu.memory_space<vmem>>, vector<16x128xf32>
    %1 = arith.truncf %0 : vector<16x128xf32> to vector<16x128xbf16>
    %c0_1 = arith.constant 0 : index
    %c0_2 = arith.constant 0 : index
    %2 = vector.load %arg4[%c0_1, %c0_2] : memref<8x128xf32, #tpu.memory_space<vmem>>, vector<8x128xf32>
    %3 = vector.extract_strided_slice %2 {offsets = [0, 0], sizes = [1, 128], strides = [1, 1]} : vector<8x128xf32> to vector<1x128xf32>
    %4 = vector.extract_strided_slice %2 {offsets = [1, 0], sizes = [1, 128], strides = [1, 1]} : vector<8x128xf32> to vector<1x128xf32>
    %5 = vector.extract_strided_slice %2 {offsets = [2, 0], sizes = [1, 128], strides = [1, 1]} : vector<8x128xf32> to vector<1x128xf32>
    %6 = vector.extract_strided_slice %2 {offsets = [3, 0], sizes = [1, 128], strides = [1, 1]} : vector<8x128xf32> to vector<1x128xf32>
    %7 = vector.extract_strided_slice %2 {offsets = [4, 0], sizes = [1, 128], strides = [1, 1]} : vector<8x128xf32> to vector<1x128xf32>
    %8 = vector.extract_strided_slice %2 {offsets = [5, 0], sizes = [1, 128], strides = [1, 1]} : vector<8x128xf32> to vector<1x128xf32>
    %c0_3 = arith.constant 0 : index
    %c0_4 = arith.constant 0 : index
    %9 = vector.load %arg2[%c0_3, %c0_4] : memref<128x128xbf16, #tpu.memory_space<vmem>>, vector<128x128xbf16>
    %cst = arith.constant dense<0.000000e+00> : vector<16x128xf32>
    %10 = tpu.matmul %1, %9, %cst {dimension_numbers = #tpu.dot_dimension_numbers<[1], [0], [0], [1], [0, 0, 1, 1], [], []>} : vector<16x128xbf16>, vector<128x128xbf16>, vector<16x128xf32> -> vector<16x128xf32>
    %11 = vector.broadcast %3 : vector<1x128xf32> to vector<16x128xf32>
    %12 = arith.addf %10, %11 : vector<16x128xf32>
    %cst_5 = arith.constant dense<0.000000e+00> : vector<16xf32>
    %13 = vector.multi_reduction <add>, %12, %cst_5 [1] : vector<16x128xf32> to vector<16xf32>
    %14 = vector.shape_cast %13 : vector<16xf32> to vector<16x1xf32>
    %cst_6 = arith.constant 3.125000e-02 : f32
    %15 = vector.broadcast %cst_6 : f32 to vector<16x1xf32>
    %16 = arith.mulf %14, %15 : vector<16x1xf32>
    %17 = vector.broadcast %16 : vector<16x1xf32> to vector<16x128xf32>
    %18 = arith.subf %12, %17 : vector<16x128xf32>
    %19 = tpu.iota {dimensions = array<i32: 1>} : vector<1x128xi32>
    %c32_i32 = arith.constant 32 : i32
    %20 = vector.broadcast %c32_i32 : i32 to vector<1x128xi32>
    %21 = arith.cmpi slt, %19, %20 : vector<1x128xi32>
    %cst_7 = arith.constant 0.000000e+00 : f32
    %22 = vector.shape_cast %21 : vector<1x128xi1> to vector<1x128xi1>
    %23 = vector.broadcast %22 : vector<1x128xi1> to vector<16x128xi1>
    %24 = vector.broadcast %cst_7 : f32 to vector<16x128xf32>
    %25 = arith.select %23, %18, %24 : vector<16x128xi1>, vector<16x128xf32>
    %26 = arith.mulf %25, %25 : vector<16x128xf32>
    %cst_8 = arith.constant dense<0.000000e+00> : vector<16xf32>
    %27 = vector.multi_reduction <add>, %26, %cst_8 [1] : vector<16x128xf32> to vector<16xf32>
    %28 = vector.shape_cast %27 : vector<16xf32> to vector<16x1xf32>
    %cst_9 = arith.constant 3.125000e-02 : f32
    %29 = vector.broadcast %cst_9 : f32 to vector<16x1xf32>
    %30 = arith.mulf %28, %29 : vector<16x1xf32>
    %cst_10 = arith.constant 9.99999974E-6 : f32
    %31 = vector.broadcast %cst_10 : f32 to vector<16x1xf32>
    %32 = arith.addf %30, %31 : vector<16x1xf32>
    %33 = math.rsqrt %32 : vector<16x1xf32>
    %34 = vector.broadcast %33 : vector<16x1xf32> to vector<16x128xf32>
    %35 = arith.mulf %25, %34 : vector<16x128xf32>
    %36 = vector.broadcast %4 : vector<1x128xf32> to vector<16x128xf32>
    %37 = arith.mulf %35, %36 : vector<16x128xf32>
    %38 = vector.broadcast %5 : vector<1x128xf32> to vector<16x128xf32>
    %39 = arith.addf %37, %38 : vector<16x128xf32>
    %cst_11 = arith.constant 0.000000e+00 : f32
    %40 = vector.broadcast %cst_11 : f32 to vector<16x128xf32>
    %41 = arith.maximumf %39, %40 : vector<16x128xf32>
    %42 = arith.truncf %41 : vector<16x128xf32> to vector<16x128xbf16>
    %c0_12 = arith.constant 0 : index
    %c0_13 = arith.constant 0 : index
    %43 = vector.load %arg3[%c0_12, %c0_13] : memref<128x128xbf16, #tpu.memory_space<vmem>>, vector<128x128xbf16>
    %cst_14 = arith.constant dense<0.000000e+00> : vector<16x128xf32>
    %44 = tpu.matmul %42, %43, %cst_14 {dimension_numbers = #tpu.dot_dimension_numbers<[1], [0], [0], [1], [0, 0, 1, 1], [], []>} : vector<16x128xbf16>, vector<128x128xbf16>, vector<16x128xf32> -> vector<16x128xf32>
    %45 = vector.broadcast %6 : vector<1x128xf32> to vector<16x128xf32>
    %46 = arith.addf %44, %45 : vector<16x128xf32>
    %cst_15 = arith.constant dense<0.000000e+00> : vector<16xf32>
    %47 = vector.multi_reduction <add>, %46, %cst_15 [1] : vector<16x128xf32> to vector<16xf32>
    %48 = vector.shape_cast %47 : vector<16xf32> to vector<16x1xf32>
    %cst_16 = arith.constant 3.125000e-02 : f32
    %49 = vector.broadcast %cst_16 : f32 to vector<16x1xf32>
    %50 = arith.mulf %48, %49 : vector<16x1xf32>
    %51 = vector.broadcast %50 : vector<16x1xf32> to vector<16x128xf32>
    %52 = arith.subf %46, %51 : vector<16x128xf32>
    %53 = tpu.iota {dimensions = array<i32: 1>} : vector<1x128xi32>
    %c32_i32_17 = arith.constant 32 : i32
    %54 = vector.broadcast %c32_i32_17 : i32 to vector<1x128xi32>
    %55 = arith.cmpi slt, %53, %54 : vector<1x128xi32>
    %cst_18 = arith.constant 0.000000e+00 : f32
    %56 = vector.shape_cast %55 : vector<1x128xi1> to vector<1x128xi1>
    %57 = vector.broadcast %56 : vector<1x128xi1> to vector<16x128xi1>
    %58 = vector.broadcast %cst_18 : f32 to vector<16x128xf32>
    %59 = arith.select %57, %52, %58 : vector<16x128xi1>, vector<16x128xf32>
    %60 = arith.mulf %59, %59 : vector<16x128xf32>
    %cst_19 = arith.constant dense<0.000000e+00> : vector<16xf32>
    %61 = vector.multi_reduction <add>, %60, %cst_19 [1] : vector<16x128xf32> to vector<16xf32>
    %62 = vector.shape_cast %61 : vector<16xf32> to vector<16x1xf32>
    %cst_20 = arith.constant 3.125000e-02 : f32
    %63 = vector.broadcast %cst_20 : f32 to vector<16x1xf32>
    %64 = arith.mulf %62, %63 : vector<16x1xf32>
    %cst_21 = arith.constant 9.99999974E-6 : f32
    %65 = vector.broadcast %cst_21 : f32 to vector<16x1xf32>
    %66 = arith.addf %64, %65 : vector<16x1xf32>
    %67 = math.rsqrt %66 : vector<16x1xf32>
    %68 = vector.broadcast %67 : vector<16x1xf32> to vector<16x128xf32>
    %69 = arith.mulf %59, %68 : vector<16x128xf32>
    %70 = vector.broadcast %7 : vector<1x128xf32> to vector<16x128xf32>
    %71 = arith.mulf %69, %70 : vector<16x128xf32>
    %72 = vector.broadcast %8 : vector<1x128xf32> to vector<16x128xf32>
    %73 = arith.addf %71, %72 : vector<16x128xf32>
    %c0_22 = arith.constant 0 : index
    %c0_23 = arith.constant 0 : index
    %74 = vector.load %arg5[%c0_22, %c0_23] : memref<16x128xf32, #tpu.memory_space<vmem>>, vector<16x128xf32>
    tpu.vector_store %arg5[%c0_22, %c0_23], %73 {strides = array<i32>} : memref<16x128xf32, #tpu.memory_space<vmem>>, vector<16x128xf32>,
    return
  }
  func.func @transform_0(%arg0: i32) -> (i32, i32) {
    %c0_i32 = arith.constant 0 : i32
    %c0_i32_0 = arith.constant 0 : i32
    return %arg0, %c0_i32 : i32, i32
  }
  func.func @transform_1(%arg0: i32) -> (i32, i32) {
    %c0_i32 = arith.constant 0 : i32
    %c0_i32_0 = arith.constant 0 : i32
    %c0_i32_1 = arith.constant 0 : i32
    return %c0_i32, %c0_i32_0 : i32, i32
  }
  func.func @transform_2(%arg0: i32) -> (i32, i32) {
    %c0_i32 = arith.constant 0 : i32
    %c0_i32_0 = arith.constant 0 : i32
    %c0_i32_1 = arith.constant 0 : i32
    return %c0_i32, %c0_i32_0 : i32, i32
  }
  func.func @transform_3(%arg0: i32) -> (i32, i32) {
    %c0_i32 = arith.constant 0 : i32
    %c0_i32_0 = arith.constant 0 : i32
    %c0_i32_1 = arith.constant 0 : i32
    return %c0_i32, %c0_i32_0 : i32, i32
  }
  func.func @transform_4(%arg0: i32) -> (i32, i32) {
    %c0_i32 = arith.constant 0 : i32
    %c0_i32_0 = arith.constant 0 : i32
    return %arg0, %c0_i32 : i32, i32
  }
}

</mosaic_0001>

<bundles_post_ra>
// kernel: modality_encoder.1
= control target key start
LH: loop header
LB: loop body
LE: loop exit
PB: predicated region body
PF: predicated region fallthrough
CT: control target
= control target key end

     0   :  { %v464_v1 = vmov 0.0   ;;  %vm465_vm0 = vmmov 0   ;;  %s599_s0 = inlined_call_operand.vmem [shape: f32[16,128], index: 0, kind: input, shape index: {}]   ;;  %s600_s1 = inlined_call_operand.vmem [shape: bf16[128,128], index: 1, kind: input, shape index: {}]   ;;  %s601_s2 = inlined_call_operand.vmem [shape: bf16[128,128], index: 2, kind: input, shape index: {}]   ;;  %s602_s3 = inlined_call_operand.vmem [shape: f32[8,128], index: 3, kind: input, shape index: {}]   ;;  %s603_s4 = inlined_call_operand.hbm [shape: f32[16,128], index: 4, kind: output, shape index: {}]  }
   0x1   :  { %v418_v0 = vld [vmem:[%s600_s1 + $0x38] sm:$0xff]   ;;  %373 = vmatprep.subr.bf16.mxu0 %v464_v1  ;;  %393 = vmatprep.subr.bf16.mxu1 %v464_v1  ;;  %v419_v2 = vld [vmem:[%s600_s1 + $0x30] sm:$0xff]   ;;  %v420_v3 = vld [vmem:[%s600_s1 + $0x28] sm:$0xff]  }
   0x2   :  { %374 = vmatpush3.bf16.msra.mxu0 %v418_v0  ;;  %389 = vmatprep.mubr.msk.bf16.mxu0 %vm465_vm0, %v464_v1  ;;  %v421_v4 = vld [vmem:[%s600_s1 + $0x20] sm:$0xff]   ;;  %v422_v5 = vld [vmem:[%s600_s1 + $0x18] sm:$0xff]  }
   0x3   :  { %375 = vmatprep.subr.bf16.mxu0 %v464_v1  ;;  %409 = vmatprep.mubr.msk.bf16.mxu1 %vm465_vm0, %v464_v1 }
   0x6   :  { %376 = vmatpush3.bf16.msra.mxu0 %v419_v2 }
   0x7   :  { %377 = vmatprep.subr.bf16.mxu0 %v464_v1 }
   0xa   :  { %378 = vmatpush3.bf16.msra.mxu0 %v420_v3 }
   0xb   :  { %379 = vmatprep.subr.bf16.mxu0 %v464_v1 }
   0xe   :  { %380 = vmatpush3.bf16.msra.mxu0 %v421_v4 }
   0xf   :  { %9 = vsyncpa [#allocation3], 0  ;;  %381 = vmatprep.subr.bf16.mxu0 %v464_v1  ;;  %v423_v6 = vld [vmem:[%s600_s1 + $0x10] sm:$0xff]   ;;  %v424_v7 = vld [vmem:[%s600_s1 + $0x8] sm:$0xff]   ;;  %v39_v12 = vlaneseq }
  0x10   :  { %v425_v8 = vld [vmem:[%s600_s1] sm:$0xff]   ;;  %v20_v10 = vld [vmem:[%s599_s0 + $0x8] sm:$0xff]  ;;  %v426_v34 = vld [vmem:[%s601_s2 + $0x38] sm:$0xff]  }
  0x11   :  { %v19_v9 = vld [vmem:[%s599_s0] sm:$0xff]  ;;  %v535_v13 = vshrl.u32 %v39_v12, 7  ;;  %v544_v23 = vand.u32 127, %v39_v12  ;;  %394 = vmatpush3.bf16.msra.mxu1 %v426_v34  ;;  %v427_v35 = vld [vmem:[%s601_s2 + $0x30] sm:$0xff]   ;;  %v428_v36 = vld [vmem:[%s601_s2 + $0x28] sm:$0xff]  }
  0x12   :  { %382 = vmatpush3.bf16.msra.mxu0 %v422_v5  ;;  %v21_v11 = vpack.c.bf16 %v20_v10, %v19_v9  ;;  %v541_v15 = vld [vmem:[%s602_s3] sm:$0xff]  ;;  %395 = vmatprep.subr.bf16.mxu1 %v464_v1  ;;  %v430_v38 = vld [vmem:[%s601_s2 + $0x18] sm:$0xff]   ;;  %v431_v39 = vld [vmem:[%s601_s2 + $0x10] sm:$0xff]  }
  0x13   :  { %383 = vmatprep.subr.bf16.mxu0 %v464_v1  ;;  %v41_v14 = vsub.s32 0, %v535_v13  ;;  %vm142_vm1 = vcmp.lt.s32.totalorder %v544_v23, 32  ;;  %v429_v37 = vld [vmem:[%s601_s2 + $0x20] sm:$0xff]   ;;  %v432_v40 = vld [vmem:[%s601_s2 + $0x8] sm:$0xff]   ;;  %v163_v48 = vsub.s32 1, %v535_v13  ;;  %v169_v50 = vsub.s32 2, %v535_v13 }
  0x14   :  { %v433_v41 = vld [vmem:[%s601_s2] sm:$0xff]   ;;  %v194_v63 = vsub.s32 3, %v535_v13  ;;  %s466_s2 = smov [#allocation2]  }
  0x15   :  { %v42_v16 = vrot.slane %v541_v15, %v41_v14  ;;  %396 = vmatpush3.bf16.msra.mxu1 %v427_v35  ;;  %v164_v49 = vrot.slane %v541_v15, %v163_v48  ;;  %v170_v54 = vrot.slane %v541_v15, %v169_v50  ;;  %s328_s24 = sshll.u32 %s466_s2, 4  ;;  %s329_s24 = int_to_ptr.vmem [resolvable:$true] %s328_s24 }
  0x16   :  { %384 = vmatpush3.bf16.msra.mxu0 %v423_v6  ;;  %397 = vmatprep.subr.bf16.mxu1 %v464_v1  ;;  %v195_v0 = vrot.slane %v541_v15, %v194_v63  ;;  %s442_s25 = scalar_lea.vmem %s329_s24, 256  ;;  %p447_p1 = scmp.lt.s32.totalorder %s329_s24, %s329_s24 }
  0x17   :  { %385 = vmatprep.subr.bf16.mxu0 %v464_v1  ;;  %p443_p0 = scmp.ne.s32.totalorder %s329_s24, %s442_s25  ;;  %p448_p2 = scmp.lt.s32.totalorder %s442_s25, %s442_s25 }
  0x19   :  { %398 = vmatpush3.bf16.msra.mxu1 %v428_v36  ;;  %p449_p3 = por %p448_p2, %p447_p1 }
  0x1a   :  { %386 = vmatpush3.bf16.msra.mxu0 %v424_v7  ;;  %399 = vmatprep.subr.bf16.mxu1 %v464_v1 }
  0x1b   :  { %387 = vmatprep.subr.bf16.mxu0 %v464_v1  ;;  %p450_p4 = pnand %p449_p3, %p443_p0 }
  0x1d   :  { %400 = vmatpush3.bf16.msra.mxu1 %v429_v37 }
  0x1e   :  { %388 = vmatpush3.bf16.msra.mxu0 %v425_v8  ;;  %401 = vmatprep.subr.bf16.mxu1 %v464_v1 }
  0x21   :  { %390 = vmatmul.mubr.bf16.vlgmr.msra.gmra.mxu0 %v21_v11  ;;  %402 = vmatpush3.bf16.msra.mxu1 %v430_v38 }
  0x22   :  { %403 = vmatprep.subr.bf16.mxu1 %v464_v1 }
  0x25   :  { %404 = vmatpush3.bf16.msra.mxu1 %v431_v39 }
  0x26   :  { %405 = vmatprep.subr.bf16.mxu1 %v464_v1 }
  0x29   :  { %406 = vmatpush3.bf16.msra.mxu1 %v432_v40 }
  0x2a   :  { %407 = vmatprep.subr.bf16.mxu1 %v464_v1 }
  0x2d   :  { %408 = vmatpush3.bf16.msra.mxu1 %v433_v41 }
  0xe1   :  { %v125_v17 = vpop.f32.mrf.mxu0 }
  0xe2   :  { %v126_v18 = vadd.f32 %v125_v17, %v42_v16 }
  0xe3   :  { %v391_v19 = vpop.f32.mrf.mxu0 }
  0xe4   :  { %132 = vadd.xlane.f32.xlu0 %v126_v18 }
  0xe5   :  { %v128_v20 = vpop.f32.mrf.mxu0 }
  0xe6   :  { %v129_v21 = vadd.f32 %v128_v20, %v42_v16 }
  0xe7   :  { %v392_v22 = vpop.f32.mrf.mxu0 }
  0xe8   :  { %134 = vadd.xlane.f32.xlu0 %v129_v21 }
 0x16d   :  { %v133_v24 = vpop.xlane.xlu0 %132 }
 0x16e   :  { %v136_v25 = vmul.f32 0.03125, %v133_v24 }
 0x170   :  { %v138_v26 = vsub.f32 %v126_v18, %v136_v25 }
 0x171   :  { %v135_v27 = vpop.xlane.xlu0 %134 }
 0x172   :  { %v137_v28 = vmul.f32 0.03125, %v135_v27  ;;  %v145_v29 = vsel %vm142_vm1, %v138_v26, 0.0  ;;  %v311_v26 = vsub.s32 4, %v535_v13  ;;  %v317_v27 = vsub.s32 5, %v535_v13 }
 0x173   :  { %v147_v30 = vmul.f32 %v145_v29, %v145_v29 }
 0x174   :  { %v139_v31 = vsub.f32 %v129_v21, %v137_v28  ;;  %v312_v28 = vrot.slane %v541_v15, %v311_v26  ;;  %v318_v23 = vrot.slane %v541_v15, %v317_v27 }
 0x175   :  { %149 = vadd.xlane.f32.xlu1 %v147_v30 }
 0x176   :  { %v146_v32 = vsel %vm142_vm1, %v139_v31, 0.0 }
 0x177   :  { %v148_v33 = vmul.f32 %v146_v32, %v146_v32 }
 0x179   :  { %151 = vadd.xlane.f32.xlu1 %v148_v33 }
 0x1fe   :  { %v150_v42 = vpop.xlane.xlu1 %149 }
 0x1ff   :  { %v153_v43 = vmul.f32 0.03125, %v150_v42 }
 0x201   :  { %v155_v44 = vadd.f32 1e-05, %v153_v43 }
 0x202   :  { %v152_v45 = vpop.xlane.xlu1 %151 }
 0x203   :  { %434 = vrsqrt.f32 %v155_v44  ;;  %v154_v46 = vmul.f32 0.03125, %v152_v45 }
 0x205   :  { %v156_v47 = vadd.f32 1e-05, %v154_v46 }
 0x207   :  { %436 = vrsqrt.f32 %v156_v47 }
 0x210   :  { %v435_v51 = vpop.eup %434 }
 0x211   :  { %v159_v52 = vmul.f32 %v435_v51, %v145_v29 }
 0x213   :  { %v165_v53 = vmul.f32 %v164_v49, %v159_v52 }
 0x214   :  { %v437_v55 = vpop.eup %436 }
 0x215   :  { %v160_v56 = vmul.f32 %v437_v55, %v146_v32  ;;  %v171_v58 = vadd.f32 %v170_v54, %v165_v53 }
 0x217   :  { %v166_v57 = vmul.f32 %v164_v49, %v160_v56  ;;  %v173_v60 = vmax.f32 %v171_v58, 0.0 }
 0x219   :  { %v172_v59 = vadd.f32 %v170_v54, %v166_v57 }
 0x21b   :  { %v174_v61 = vmax.f32 %v172_v59, 0.0 }
 0x21d   :  { %v175_v62 = vpack.c.bf16 %v174_v61, %v173_v60 }
 0x21f   :  { %410 = vmatmul.mubr.bf16.vlgmr.msra.gmra.mxu1 %v175_v62 }
 0x2df   :  { %v278_v1 = vpop.f32.mrf.mxu1 }
 0x2e0   :  { %v279_v2 = vadd.f32 %v278_v1, %v195_v0 }
 0x2e1   :  { %v411_v3 = vpop.f32.mrf.mxu1 }
 0x2e2   :  { %285 = vadd.xlane.f32.xlu0 %v279_v2 }
 0x2e3   :  { %v281_v4 = vpop.f32.mrf.mxu1 }
 0x2e4   :  { %v282_v5 = vadd.f32 %v281_v4, %v195_v0 }
 0x2e5   :  { %v412_v6 = vpop.f32.mrf.mxu1 }
 0x2e6   :  { %287 = vadd.xlane.f32.xlu1 %v282_v5 }
 0x36b   :  { %v286_v7 = vpop.xlane.xlu0 %285 }
 0x36c   :  { %v289_v8 = vmul.f32 0.03125, %v286_v7 }
 0x36e   :  { %v291_v9 = vsub.f32 %v279_v2, %v289_v8 }
 0x36f   :  { %v288_v10 = vpop.xlane.xlu1 %287 }
 0x370   :  { %v290_v11 = vmul.f32 0.03125, %v288_v10  ;;  %v293_v12 = vsel %vm142_vm1, %v291_v9, 0.0 }
 0x371   :  { %v295_v14 = vmul.f32 %v293_v12, %v293_v12 }
 0x372   :  { %v292_v16 = vsub.f32 %v282_v5, %v290_v11 }
 0x373   :  { %297 = vadd.xlane.f32.xlu0 %v295_v14 }
 0x374   :  { %v294_v17 = vsel %vm142_vm1, %v292_v16, 0.0 }
 0x375   :  { %v296_v18 = vmul.f32 %v294_v17, %v294_v17 }
 0x377   :  { %299 = vadd.xlane.f32.xlu1 %v296_v18 }
 0x3fc   :  { %v298_v19 = vpop.xlane.xlu0 %297 }
 0x3fd   :  { %v301_v20 = vmul.f32 0.03125, %v298_v19 }
 0x3ff   :  { %v303_v21 = vadd.f32 1e-05, %v301_v20 }
 0x400   :  { %v300_v22 = vpop.xlane.xlu1 %299 }
 0x401   :  { %438 = vrsqrt.f32 %v303_v21  ;;  %v302_v24 = vmul.f32 0.03125, %v300_v22 }
 0x403   :  { %v304_v25 = vadd.f32 1e-05, %v302_v24 }
 0x405   :  { %440 = vrsqrt.f32 %v304_v25 }
 0x40e   :  { %v439_v29 = vpop.eup %438 }
 0x40f   :  { %v307_v30 = vmul.f32 %v439_v29, %v293_v12 }
 0x411   :  { %v313_v31 = vmul.f32 %v312_v28, %v307_v30 }
 0x412   :  { %v441_v32 = vpop.eup %440 }
 0x413   :  { %v308_v33 = vmul.f32 %v441_v32, %v294_v17  ;;  %v319_v34 = vadd.f32 %v318_v23, %v313_v31 }
 0x415   :  { %v314_v35 = vmul.f32 %v312_v28, %v308_v33  ;;  %321 = vst [vmem:[#allocation2] sm:$0xff] %v319_v34 }
 0x417   :  { %v320_v36 = vadd.f32 %v318_v23, %v314_v35 }
 0x419   :  { %322 = vst [vmem:[#allocation2 + $0x8] sm:$0xff] %v320_v36 }
 0x41a   :  { %453 = shalt.err (!%p450_p4)
}
 0x41b   :  { %s467_s26 = smov 128   ;;  %s468_s27 = smov 8  }
 0x41c   :  { %334 = dma.vmem_to_hbm [thread:$0]  %s329_s24, 256, %s603_s4, [#allocation3], %s467_s26, %s467_s26, %s468_s27  }
 0x41d   :  { %462 = dma.done.wait [#allocation3], 256  }
 0x41e   :  { %463 = vsyncadd [#allocation3], 4294967040 }
 0x41f   :  { %338 = vsyncpa [#allocation3], 1 }

</bundles_post_ra>
